<compile_context>
chip_gen: v7x
topology: tpu7x:2x2x1
jax: 0.10.0
libtpu: 0.0.40
codegen_flags: <defaults>
</compile_context>

<pallas_src>
import jax
import jax.numpy as jnp
from jax.experimental import pallas as pl
from jax.experimental.pallas import tpu as pltpu

N_QUBITS = 3
N_LAYERS = 2
DIM = 2 ** N_QUBITS          # 8
BATCH = 2

LANES = 128                  # lane-dense width (full vreg lane dim)
SUBLANES = 8                 # sublane-dense batch tile
HIGHEST = jax.lax.Precision.HIGHEST

# ---------------------------------------------------------------------------
# Gate construction + chain composition (plain-JAX parameter "glue")
# ---------------------------------------------------------------------------
I2 = jnp.eye(2, dtype=jnp.complex64)
X2 = jnp.array([[0, 1], [1, 0]], dtype=jnp.complex64)
Y2 = jnp.array([[0, -1j], [1j, 0]], dtype=jnp.complex64)
P0 = jnp.array([[1, 0], [0, 0]], dtype=jnp.complex64)
P1 = jnp.array([[0, 0], [0, 1]], dtype=jnp.complex64)


def _kron_chain(mats):
    full = mats[0]
    for m in mats[1:]:
        full = jnp.kron(full, m)
    return full


def _embed_1q(gate2, target):
    mats = [I2] * N_QUBITS
    mats[target] = gate2
    return _kron_chain(mats)


def rx2(theta):
    c = jnp.cos(theta / 2).astype(jnp.complex64)
    s = jnp.sin(theta / 2).astype(jnp.complex64)
    return c * I2 - 1j * s * X2


def ry2(theta):
    c = jnp.cos(theta / 2).astype(jnp.complex64)
    s = jnp.sin(theta / 2).astype(jnp.complex64)
    return c * I2 - 1j * s * Y2


def rz2(theta):
    t = theta.astype(jnp.complex64)
    return jnp.exp(-0.5j * t) * P0 + jnp.exp(0.5j * t) * P1


def cnot_full(control, target):
    mats0 = [I2] * N_QUBITS
    mats0[control] = P0
    mats1 = [I2] * N_QUBITS
    mats1[control] = P1
    mats1[target] = X2
    return _kron_chain(mats0) + _kron_chain(mats1)


def entanglement_unitary():
    """Constant CNOT-chain product E = CNOT(n-2,n-1) @ ... @ CNOT(0,1)
    (first-applied gate is rightmost)."""
    E = jnp.eye(DIM, dtype=jnp.complex64)
    for i in range(N_QUBITS - 1):
        E = jnp.matmul(cnot_full(i, i + 1), E, precision=HIGHEST)
    return E


def build_gate_list(rotation_params):
    """Full-dimension gates in application order (first applied = index 0),
    matching PQCLayer.forward exactly.  Used only by the reference check."""
    gates = []
    for layer in range(N_LAYERS):
        for q in range(N_QUBITS):
            gates.append(_embed_1q(rx2(rotation_params[layer, q, 0]), q))
            gates.append(_embed_1q(ry2(rotation_params[layer, q, 1]), q))
            gates.append(_embed_1q(rz2(rotation_params[layer, q, 2]), q))
        for i in range(N_QUBITS - 1):
            gates.append(cnot_full(i, i + 1))
    return gates


def compose_unitary(rotation_params):
    """U such that |psi> <- U |psi> applies the whole circuit.

    Per layer: fuse each qubit's rotations into one 2x2 (RZ@RY@RX, since RX is
    applied first), kron across qubits (single-qubit gates on distinct qubits
    commute), then left-multiply by the constant CNOT chain."""
    E = entanglement_unitary()
    U = jnp.eye(DIM, dtype=jnp.complex64)
    for layer in range(N_LAYERS):
        per_qubit = []
        for q in range(N_QUBITS):
            gq = jnp.matmul(
                rz2(rotation_params[layer, q, 2]),
                jnp.matmul(ry2(rotation_params[layer, q, 1]),
                           rx2(rotation_params[layer, q, 0]),
                           precision=HIGHEST),
                precision=HIGHEST)
            per_qubit.append(gq)
        R = _kron_chain(per_qubit)                     # (D, D) layer rotations
        L = jnp.matmul(E, R, precision=HIGHEST)        # rotations then CNOTs
        U = jnp.matmul(L, U, precision=HIGHEST)
    return U


def real_embed_padded(U):
    """Real embedding for row-vector states: [x|y] @ M = [re|im] of U @ psi,
    zero-padded to a lane-dense (128, 128) tile."""
    Ur = jnp.real(U).astype(jnp.float32)
    Ui = jnp.imag(U).astype(jnp.float32)
    top = jnp.concatenate([Ur.T, Ui.T], axis=1)        # (D, 2D)
    bot = jnp.concatenate([-Ui.T, Ur.T], axis=1)       # (D, 2D)
    M = jnp.concatenate([top, bot], axis=0)            # (2D, 2D)
    Mp = jnp.zeros((LANES, LANES), jnp.float32).at[:2 * DIM, :2 * DIM].set(M)
    return Mp


# ---------------------------------------------------------------------------
# Pallas kernel: one lane-dense real matmul applies the whole circuit
# ---------------------------------------------------------------------------
def pqc_apply_kernel(m_ref, s_ref, o_ref):
    # m_ref: (128, 128) padded real-embedded composed unitary (already ^T form)
    # s_ref: (8, 128)   padded packed batch of states [re | im | zeros]
    # o_ref: (8, 128)   unmasked full-lane store
    o_ref[...] = jnp.dot(
        s_ref[...], m_ref[...],
        preferred_element_type=jnp.float32,
        precision=HIGHEST,
    )


@jax.jit
def pqc_forward(state_re, state_im, rotation_params):
    B, D = state_re.shape
    # --- parameter glue: compose circuit, real-embed, pad lane-dense ---
    Mp = real_embed_padded(compose_unitary(rotation_params))
    packed = jnp.concatenate([state_re, state_im], axis=1)          # (B, 2D)
    Bp = ((B + SUBLANES - 1) // SUBLANES) * SUBLANES                # pad batch
    Sp = jnp.zeros((Bp, LANES), jnp.float32).at[:B, :2 * D].set(packed)

    out = pl.pallas_call(
        pqc_apply_kernel,
        out_shape=jax.ShapeDtypeStruct((Bp, LANES), jnp.float32),
        grid=(Bp // SUBLANES,),
        in_specs=[
            pl.BlockSpec((LANES, LANES), lambda b: (0, 0),
                         memory_space=pltpu.MemorySpace.VMEM),
            pl.BlockSpec((SUBLANES, LANES), lambda b: (b, 0),
                         memory_space=pltpu.MemorySpace.VMEM),
        ],
        out_specs=pl.BlockSpec((SUBLANES, LANES), lambda b: (b, 0),
                               memory_space=pltpu.MemorySpace.VMEM),
        compiler_params=pltpu.CompilerParams(
            dimension_semantics=("parallel",)),   # v7x: 2 TCs split the batch
    )(Mp, Sp)

    return out[:B, :D], out[:B, D:2 * D]


# ---------------------------------------------------------------------------
if __name__ == "__main__":
    key = jax.random.PRNGKey(0)
    k_param, k_re, k_im = jax.random.split(key, 3)

    # deterministic "torch.randn"-style parameter init
    rotation_params = jax.random.normal(
        k_param, (N_LAYERS, N_QUBITS, 3), dtype=jnp.float32)

    # deterministic normalized input quantum state (batch of state vectors)
    sr = jax.random.normal(k_re, (BATCH, DIM), dtype=jnp.float32)
    si = jax.random.normal(k_im, (BATCH, DIM), dtype=jnp.float32)
    norm = jnp.sqrt(jnp.sum(sr * sr + si * si, axis=-1, keepdims=True))
    sr = sr / norm
    si = si / norm

    out_re, out_im = pqc_forward(sr, si, rotation_params)
    jax.block_until_ready((out_re, out_im))

    # plain-JAX complex reference: apply every gate sequentially, same order
    # as PQCLayer.forward (state <- G state, row-vector form: s <- s @ G^T).
    ref = (sr + 1j * si).astype(jnp.complex64)
    for g in build_gate_list(rotation_params):
        ref = jnp.matmul(ref, jnp.transpose(g), precision=HIGHEST)
    got = out_re + 1j * out_im
    assert jnp.allclose(got, ref, atol=2e-4, rtol=2e-4), "mismatch vs reference"

    print("KERNEL_OK")
</pallas_src>

<mosaic_0001>
module attributes {stable_mosaic.version = 11 : i64} {
  func.func @pqc_apply_kernel(%arg0: i32, %arg1: memref<128x128xf32, #tpu.memory_space<vmem>>, %arg2: memref<8x128xf32, #tpu.memory_space<vmem>>, %arg3: memref<8x128xf32, #tpu.memory_space<vmem>>) attributes {dimension_semantics = [#tpu.dimension_semantics<parallel>], iteration_bounds = array<i64: 1>, scalar_prefetch = 0 : i64, scratch_operands = 0 : i64, tpu.core_type = #tpu.core_type<tc>, window_params = [{pipeline_mode = #tpu.pipeline_mode<synchronous>, transform_indices = @transform_0, window_bounds = array<i64: 128, 128>}, {transform_indices = @transform_1, window_bounds = array<i64: 8, 128>}, {transform_indices = @transform_2, window_bounds = array<i64: 8, 128>}]} {
    %c0 = arith.constant 0 : index
    %c0_0 = arith.constant 0 : index
    %0 = vector.load %arg2[%c0, %c0_0] : memref<8x128xf32, #tpu.memory_space<vmem>>, vector<8x128xf32>
    %c0_1 = arith.constant 0 : index
    %c0_2 = arith.constant 0 : index
    %1 = vector.load %arg1[%c0_1, %c0_2] : memref<128x128xf32, #tpu.memory_space<vmem>>, vector<128x128xf32>
    %cst = arith.constant dense<0.000000e+00> : vector<8x128xf32>
    %2 = tpu.matmul %0, %1, %cst {dimension_numbers = #tpu.dot_dimension_numbers<[1], [0], [0], [1], [0, 0, 1, 1], [], []>, precision = #tpu.contract_precision<fp32>} : vector<8x128xf32>, vector<128x128xf32>, vector<8x128xf32> -> vector<8x128xf32>
    %c0_3 = arith.constant 0 : index
    %c0_4 = arith.constant 0 : index
    %3 = vector.load %arg3[%c0_3, %c0_4] : memref<8x128xf32, #tpu.memory_space<vmem>>, vector<8x128xf32>
    tpu.vector_store %arg3[%c0_3, %c0_4], %2 {strides = array<i32>} : memref<8x128xf32, #tpu.memory_space<vmem>>, vector<8x128xf32>,
    return
  }
  func.func @transform_0(%arg0: i32) -> (i32, i32) {
    %c0_i32 = arith.constant 0 : i32
    %c0_i32_0 = arith.constant 0 : i32
    %c0_i32_1 = arith.constant 0 : i32
    return %c0_i32, %c0_i32_0 : i32, i32
  }
  func.func @transform_1(%arg0: i32) -> (i32, i32) {
    %c0_i32 = arith.constant 0 : i32
    %c0_i32_0 = arith.constant 0 : i32
    return %arg0, %c0_i32 : i32, i32
  }
  func.func @transform_2(%arg0: i32) -> (i32, i32) {
    %c0_i32 = arith.constant 0 : i32
    %c0_i32_0 = arith.constant 0 : i32
    return %arg0, %c0_i32 : i32, i32
  }
}

</mosaic_0001>

<bundles_post_ra>
// kernel: pqc_forward.1
= control target key start
LH: loop header
LB: loop body
LE: loop exit
PB: predicated region body
PF: predicated region fallthrough
CT: control target
= control target key end

     0   :  { %v1142_v0 = vmov 0.0|0.0   ;;  %vm1143_vm0 = vmmov 0   ;;  %v1144_v8 = vmov 0.0   ;;  %s1461_s0 = inlined_call_operand.vmem [shape: f32[128,128], index: 0, kind: input, shape index: {}]   ;;  %s1462_s1 = inlined_call_operand.vmem [shape: f32[8,128], index: 1, kind: input, shape index: {}]   ;;  %s1463_s2 = inlined_call_operand.vmem [shape: f32[8,128], index: 2, kind: output, shape index: {}]  }
   0x1   :  { %986 = vmatprep.subr.bf16.mxu1 %v1142_v0  ;;  %1058 = vmatprep.subr.bf16.mxu0 %v1142_v0  ;;  %v12_v1 = vld [vmem:[%s1461_s0] sm:$0xff]  ;;  %v13_v2 = vld [vmem:[%s1461_s0 + $0x8] sm:$0xff]  ;;  %v14_v3 = vld [vmem:[%s1461_s0 + $0x10] sm:$0xff] }
   0x2   :  { %v29_v4 = vand.u32 4294901760, %v12_v1  ;;  %v32_v5 = vand.u32 4294901760, %v13_v2  ;;  %v15_v6 = vld [vmem:[%s1461_s0 + $0x18] sm:$0xff]  ;;  %v35_v7 = vand.u32 4294901760, %v14_v3  ;;  %808 = vmatprep.mubr.msk.f32.mxu1 %vm1143_vm0, %v1144_v8  ;;  %913 = vmatprep.mubr.msk.f32.mxu0 %vm1143_vm0, %v1144_v8  ;;  %v16_v10 = vld [vmem:[%s1461_s0 + $0x20] sm:$0xff]  ;;  %v17_v11 = vld [vmem:[%s1461_s0 + $0x28] sm:$0xff] }
   0x3   :  { %v38_v9 = vand.u32 4294901760, %v15_v6  ;;  %v41_v14 = vand.u32 4294901760, %v16_v10  ;;  %v44_v15 = vand.u32 4294901760, %v17_v11  ;;  %v18_v16 = vld [vmem:[%s1461_s0 + $0x30] sm:$0xff]  ;;  %v19_v17 = vld [vmem:[%s1461_s0 + $0x38] sm:$0xff]  ;;  %v1207_v21 = vld [vmem:[%s1461_s0 + $0x40] sm:$0xff] }
   0x4   :  { %v1184_v12 = vpack.c.bf16 %v32_v5, %v29_v4  ;;  %v47_v19 = vand.u32 4294901760, %v18_v16  ;;  %v50_v20 = vand.u32 4294901760, %v19_v17  ;;  %v1212_v22 = vld [vmem:[%s1461_s0 + $0x48] sm:$0xff]  ;;  %v53_v24 = vand.u32 4294901760, %v1207_v21  ;;  %v11_v26 = vld [vmem:[%s1462_s1] sm:$0xff]  ;;  %v1228_v27 = vld [vmem:[%s1461_s0 + $0x50] sm:$0xff] }
   0x5   :  { %v1188_v13 = vpack.c.bf16 %v38_v9, %v35_v7  ;;  %v1200_v18 = vpack.c.bf16 %v44_v15, %v41_v14  ;;  %v56_v25 = vand.u32 4294901760, %v1212_v22  ;;  %v1233_v28 = vld [vmem:[%s1461_s0 + $0x58] sm:$0xff]  ;;  %v1235_v29 = vsub.f32 %v12_v1, %v29_v4  ;;  %v1250_v35 = vld [vmem:[%s1461_s0 + $0x60] sm:$0xff]  ;;  %v1257_v36 = vld [vmem:[%s1461_s0 + $0x68] sm:$0xff] }
   0x6   :  { %988 = vmatpush3.bf16.msra.mxu1 %v1184_v12  ;;  %1060 = vmatpush3.bf16.msra.mxu0 %v1184_v12  ;;  %v1216_v23 = vpack.c.bf16 %v50_v20, %v47_v19  ;;  %v1237_v30 = vand.u32 4294901760, %v11_v26  ;;  %v1239_v31 = vsub.f32 %v13_v2, %v32_v5  ;;  %v59_v33 = vand.u32 4294901760, %v1228_v27  ;;  %v1279_v43 = vld [vmem:[%s1461_s0 + $0x70] sm:$0xff]  ;;  %v1284_v44 = vld [vmem:[%s1461_s0 + $0x78] sm:$0xff] }
   0x7   :  { %989 = vmatprep.subr.bf16.mxu1 %v1142_v0  ;;  %1061 = vmatprep.subr.bf16.mxu0 %v1142_v0  ;;  %v1243_v32 = vpack.c.bf16 %v56_v25, %v53_v24  ;;  %v62_v34 = vand.u32 4294901760, %v1233_v28  ;;  %v1259_v37 = vsub.f32 %v14_v3, %v35_v7  ;;  %v1261_v38 = vsub.f32 %v15_v6, %v38_v9 }
   0x8   :  { %v65_v39 = vand.u32 4294901760, %v1250_v35  ;;  %v1265_v40 = vsub.f32 %v11_v26, %v1237_v30  ;;  %v68_v42 = vand.u32 4294901760, %v1257_v36  ;;  %v122_v45 = vand.u32 4294901760, %v1235_v29 }
   0x9   :  { %v1273_v41 = vpack.c.bf16 %v62_v34, %v59_v33  ;;  %v129_v46 = vand.u32 4294901760, %v1239_v31  ;;  %v1290_v47 = vsub.f32 %v16_v10, %v41_v14  ;;  %v1292_v48 = vsub.f32 %v17_v11, %v44_v15 }
   0xa   :  { %991 = vmatpush3.bf16.msra.mxu1 %v1188_v13  ;;  %1063 = vmatpush3.bf16.msra.mxu0 %v1188_v13  ;;  %v71_v49 = vand.u32 4294901760, %v1279_v43  ;;  %v74_v50 = vand.u32 4294901760, %v1284_v44  ;;  %v111_v51 = vand.u32 4294901760, %v1265_v40  ;;  %v136_v52 = vand.u32 4294901760, %v1259_v37 }
   0xb   :  { %992 = vmatprep.subr.bf16.mxu1 %v1142_v0  ;;  %1064 = vmatprep.subr.bf16.mxu0 %v1142_v0  ;;  %v1304_v53 = vpack.c.bf16 %v68_v42, %v65_v39  ;;  %v123_v54 = vsub.f32 %v1235_v29, %v122_v45  ;;  %v130_v55 = vsub.f32 %v1239_v31, %v129_v46  ;;  %v143_v56 = vand.u32 4294901760, %v1261_v38 }
   0xc   :  { %v1311_v57 = vsub.f32 %v18_v16, %v47_v19  ;;  %v1313_v58 = vsub.f32 %v19_v17, %v50_v20  ;;  %v112_v59 = vsub.f32 %v1265_v40, %v111_v51  ;;  %v137_v60 = vsub.f32 %v1259_v37, %v136_v52 }
   0xd   :  { %v150_v61 = vand.u32 4294901760, %v1290_v47  ;;  %v157_v62 = vand.u32 4294901760, %v1292_v48  ;;  %v1325_v63 = vpack.c.bf16 %v74_v50, %v71_v49  ;;  %v124_v1 = vand.u32 4294901760, %v123_v54 }
   0xe   :  { %994 = vmatpush3.bf16.msra.mxu1 %v1200_v18  ;;  %1066 = vmatpush3.bf16.msra.mxu0 %v1200_v18  ;;  %v131_v2 = vand.u32 4294901760, %v130_v55  ;;  %v144_v3 = vsub.f32 %v1261_v38, %v143_v56  ;;  %v1331_v4 = vsub.f32 %v1207_v21, %v53_v24  ;;  %v1334_v5 = vsub.f32 %v1212_v22, %v56_v25 }
   0xf   :  { %995 = vmatprep.subr.bf16.mxu1 %v1142_v0  ;;  %1067 = vmatprep.subr.bf16.mxu0 %v1142_v0  ;;  %v1083_v6 = vpack.c.bf16 %v129_v46, %v122_v45  ;;  %v113_v7 = vand.u32 4294901760, %v112_v59  ;;  %v138_v9 = vand.u32 4294901760, %v137_v60  ;;  %v151_v10 = vsub.f32 %v1290_v47, %v150_v61 }
  0x10   :  { %v158_v11 = vsub.f32 %v1292_v48, %v157_v62  ;;  %v1011_v14 = vpack.c.bf16 %v131_v2, %v124_v1  ;;  %v145_v15 = vand.u32 4294901760, %v144_v3  ;;  %v164_v16 = vand.u32 4294901760, %v1311_v57 }
  0x11   :  { %v171_v17 = vand.u32 4294901760, %v1313_v58  ;;  %v1347_v19 = vsub.f32 %v1228_v27, %v59_v33  ;;  %v1352_v20 = vsub.f32 %v1233_v28, %v62_v34  ;;  %v1086_v21 = vpack.c.bf16 %v143_v56, %v136_v52 }
  0x12   :  { %997 = vmatpush3.bf16.msra.mxu1 %v1216_v23  ;;  %1069 = vmatpush3.bf16.msra.mxu0 %v1216_v23  ;;  %v152_v22 = vand.u32 4294901760, %v151_v10  ;;  %v159_v24 = vand.u32 4294901760, %v158_v11  ;;  %v178_v25 = vand.u32 4294901760, %v1331_v4  ;;  %v1014_v26 = vpack.c.bf16 %v145_v15, %v138_v9 }
  0x13   :  { %998 = vmatprep.subr.bf16.mxu1 %v1142_v0  ;;  %1070 = vmatprep.subr.bf16.mxu0 %v1142_v0  ;;  %v165_v45 = vsub.f32 %v1311_v57, %v164_v16  ;;  %v172_v27 = vsub.f32 %v1313_v58, %v171_v17  ;;  %v185_v33 = vand.u32 4294901760, %v1334_v5  ;;  %v1363_v28 = vsub.f32 %v1250_v35, %v65_v39 }
  0x14   :  { %v1368_v34 = vsub.f32 %v1257_v36, %v68_v42  ;;  %v1017_v46 = vpack.c.bf16 %v159_v24, %v152_v22  ;;  %v179_v52 = vsub.f32 %v1331_v4, %v178_v25  ;;  %v192_v54 = vand.u32 4294901760, %v1347_v19 }
  0x15   :  { %v166_v35 = vand.u32 4294901760, %v165_v45  ;;  %v173_v39 = vand.u32 4294901760, %v172_v27  ;;  %v186_v55 = vsub.f32 %v1334_v5, %v185_v33  ;;  %v199_v36 = vand.u32 4294901760, %v1352_v20 }
  0x16   :  { %1000 = vmatpush3.bf16.msra.mxu1 %v1243_v32  ;;  %1072 = vmatpush3.bf16.msra.mxu0 %v1243_v32  ;;  %v1383_v42 = vsub.f32 %v1279_v43, %v71_v49  ;;  %v1388_v56 = vsub.f32 %v1284_v44, %v74_v50  ;;  %v1092_v59 = vpack.c.bf16 %v171_v17, %v164_v16  ;;  %v180_v60 = vand.u32 4294901760, %v179_v52 }
  0x17   :  { %1001 = vmatprep.subr.bf16.mxu1 %v1142_v0  ;;  %1073 = vmatprep.subr.bf16.mxu0 %v1142_v0  ;;  %v1020_v1 = vpack.c.bf16 %v173_v39, %v166_v35  ;;  %v187_v2 = vand.u32 4294901760, %v186_v55  ;;  %v200_v3 = vsub.f32 %v1352_v20, %v199_v36  ;;  %v213_v43 = vand.u32 4294901760, %v1368_v34 }
  0x18   :  { %v1095_v44 = vpack.c.bf16 %v185_v33, %v178_v25  ;;  %v227_v11 = vand.u32 4294901760, %v1388_v56 }
  0x19   :  { %v201_v9 = vand.u32 4294901760, %v200_v3  ;;  %v214_v10 = vsub.f32 %v1368_v34, %v213_v43 }
  0x1a   :  { %1003 = vmatpush3.bf16.msra.mxu1 %v1273_v41  ;;  %1075 = vmatpush3.bf16.msra.mxu0 %v1273_v41  ;;  %v228_v22 = vsub.f32 %v1388_v56, %v227_v11 }
  0x1b   :  { %1004 = vmatprep.subr.bf16.mxu1 %v1142_v0  ;;  %1076 = vmatprep.subr.bf16.mxu0 %v1142_v0  ;;  %v215_v17 = vand.u32 4294901760, %v214_v10 }
  0x1c   :  { %v229_v45 = vand.u32 4294901760, %v228_v22 }
  0x1e   :  { %1006 = vmatpush3.bf16.msra.mxu1 %v1304_v53  ;;  %1078 = vmatpush3.bf16.msra.mxu0 %v1304_v53 }
  0x1f   :  { %1007 = vmatprep.subr.bf16.mxu1 %v1142_v0  ;;  %1079 = vmatprep.subr.bf16.mxu0 %v1142_v0 }
  0x22   :  { %1009 = vmatpush3.bf16.msra.mxu1 %v1325_v63  ;;  %1081 = vmatpush3.bf16.msra.mxu0 %v1325_v63 }
  0x23   :  { %1010 = vmatprep.subr.bf16.mxu1 %v1142_v0  ;;  %1082 = vmatprep.subr.bf16.mxu0 %v1142_v0 }
  0x25   :  { %809 = vmatmul.mubr.f32.vlgmr.msra.gmra.mrb[0].mxu1 %v113_v7  ;;  %914 = vmatmul.mubr.f32.vlgmr.msra.gmra.mrb[0].mxu0 %v111_v51  ;;  %v1089_v51 = vpack.c.bf16 %v157_v62, %v150_v61  ;;  %v193_v61 = vsub.f32 %v1347_v19, %v192_v54  ;;  %v206_v62 = vand.u32 4294901760, %v1363_v28  ;;  %v1023_v7 = vpack.c.bf16 %v187_v2, %v180_v60 }
  0x26   :  { %1012 = vmatpush3.bf16.msra.mxu1 %v1011_v14  ;;  %1084 = vmatpush3.bf16.msra.mxu0 %v1083_v6  ;;  %v220_v6 = vand.u32 4294901760, %v1383_v42  ;;  %v1098_v14 = vpack.c.bf16 %v199_v36, %v192_v54 }
  0x27   :  { %1013 = vmatprep.subr.bf16.mxu1 %v1142_v0  ;;  %1085 = vmatprep.subr.bf16.mxu0 %v1142_v0  ;;  %v194_v49 = vand.u32 4294901760, %v193_v61  ;;  %v207_v50 = vsub.f32 %v1363_v28, %v206_v62  ;;  %v1101_v25 = vpack.c.bf16 %v213_v43, %v206_v62 }
  0x28   :  { %843 = vmatprep.mubr.msk.f32.mxu1 %vm1143_vm0, %v1144_v8  ;;  %948 = vmatprep.mubr.msk.f32.mxu0 %vm1143_vm0, %v1144_v8  ;;  %v1104_v33 = vpack.c.bf16 %v227_v11, %v220_v6 }
  0x29   :  { %v208_v15 = vand.u32 4294901760, %v207_v50  ;;  %v1026_v16 = vpack.c.bf16 %v201_v9, %v194_v49 }
  0x2a   :  { %1015 = vmatpush3.bf16.msra.mxu1 %v1014_v26  ;;  %1087 = vmatpush3.bf16.msra.mxu0 %v1086_v21  ;;  %v221_v21 = vsub.f32 %v1383_v42, %v220_v6 }
  0x2b   :  { %1016 = vmatprep.subr.bf16.mxu1 %v1142_v0  ;;  %1088 = vmatprep.subr.bf16.mxu0 %v1142_v0  ;;  %v1029_v24 = vpack.c.bf16 %v215_v17, %v208_v15 }
  0x2c   :  { %v222_v26 = vand.u32 4294901760, %v221_v21 }
  0x2e   :  { %1018 = vmatpush3.bf16.msra.mxu1 %v1017_v46  ;;  %1090 = vmatpush3.bf16.msra.mxu0 %v1089_v51  ;;  %v1032_v27 = vpack.c.bf16 %v229_v45, %v222_v26  ;;  %v1035_v46 = vpack.c.bf16 %v1239_v31, %v1235_v29  ;;  %v1038_v51 = vpack.c.bf16 %v1261_v38, %v1259_v37 }
  0x2f   :  { %1019 = vmatprep.subr.bf16.mxu1 %v1142_v0  ;;  %1091 = vmatprep.subr.bf16.mxu0 %v1142_v0  ;;  %v1041_v29 = vpack.c.bf16 %v1292_v48, %v1290_v47 }
  0x32   :  { %1021 = vmatpush3.bf16.msra.mxu1 %v1020_v1  ;;  %1093 = vmatpush3.bf16.msra.mxu0 %v1092_v59 }
  0x33   :  { %1022 = vmatprep.subr.bf16.mxu1 %v1142_v0  ;;  %1094 = vmatprep.subr.bf16.mxu0 %v1142_v0 }
  0x36   :  { %1024 = vmatpush3.bf16.msra.mxu1 %v1023_v7  ;;  %1096 = vmatpush3.bf16.msra.mxu0 %v1095_v44 }
  0x37   :  { %1025 = vmatprep.subr.bf16.mxu1 %v1142_v0  ;;  %1097 = vmatprep.subr.bf16.mxu0 %v1142_v0 }
  0x3a   :  { %1027 = vmatpush3.bf16.msra.mxu1 %v1026_v16  ;;  %1099 = vmatpush3.bf16.msra.mxu0 %v1098_v14 }
  0x3b   :  { %1028 = vmatprep.subr.bf16.mxu1 %v1142_v0  ;;  %1100 = vmatprep.subr.bf16.mxu0 %v1142_v0 }
  0x3e   :  { %1030 = vmatpush3.bf16.msra.mxu1 %v1029_v24  ;;  %1102 = vmatpush3.bf16.msra.mxu0 %v1101_v25 }
  0x3f   :  { %1031 = vmatprep.subr.bf16.mxu1 %v1142_v0  ;;  %1103 = vmatprep.subr.bf16.mxu0 %v1142_v0 }
  0x42   :  { %1033 = vmatpush3.bf16.msra.mxu1 %v1032_v27  ;;  %1105 = vmatpush3.bf16.msra.mxu0 %v1104_v33 }
  0x43   :  { %1034 = vmatprep.subr.bf16.mxu1 %v1142_v0  ;;  %1106 = vmatprep.subr.bf16.mxu0 %v1142_v0 }
  0x45   :  { %844 = vmatmul.mubr.f32.vlgmr.msra.gmra.mrb[0].mxu1 %v1237_v30  ;;  %949 = vmatmul.mubr.f32.vlgmr.msra.gmra.mrb[0].mxu0 %v1237_v30 }
  0x46   :  { %1036 = vmatpush3.bf16.msra.mxu1 %v1035_v46  ;;  %1108 = vmatpush3.bf16.msra.mxu0 %v1184_v12  ;;  %v1044_v12 = vpack.c.bf16 %v1313_v58, %v1311_v57 }
  0x47   :  { %1037 = vmatprep.subr.bf16.mxu1 %v1142_v0  ;;  %1109 = vmatprep.subr.bf16.mxu0 %v1142_v0 }
  0x48   :  { %878 = vmatprep.mubr.msk.f32.mxu1 %vm1143_vm0, %v1144_v8  ;;  %983 = vmatprep.mubr.msk.f32.mxu0 %vm1143_vm0, %v1144_v8  ;;  %v1047_v8 = vpack.c.bf16 %v1334_v5, %v1331_v4 }
  0x4a   :  { %1039 = vmatpush3.bf16.msra.mxu1 %v1038_v51  ;;  %1111 = vmatpush3.bf16.msra.mxu0 %v1188_v13  ;;  %v1050_v13 = vpack.c.bf16 %v1352_v20, %v1347_v19 }
  0x4b   :  { %1040 = vmatprep.subr.bf16.mxu1 %v1142_v0  ;;  %1112 = vmatprep.subr.bf16.mxu0 %v1142_v0 }
  0x4e   :  { %1042 = vmatpush3.bf16.msra.mxu1 %v1041_v29  ;;  %1114 = vmatpush3.bf16.msra.mxu0 %v1200_v18  ;;  %v1053_v18 = vpack.c.bf16 %v1368_v34, %v1363_v28 }
  0x4f   :  { %1043 = vmatprep.subr.bf16.mxu1 %v1142_v0  ;;  %1115 = vmatprep.subr.bf16.mxu0 %v1142_v0 }
  0x52   :  { %1045 = vmatpush3.bf16.msra.mxu1 %v1044_v12  ;;  %1117 = vmatpush3.bf16.msra.mxu0 %v1216_v23  ;;  %v1056_v23 = vpack.c.bf16 %v1388_v56, %v1383_v42 }
  0x53   :  { %1046 = vmatprep.subr.bf16.mxu1 %v1142_v0  ;;  %1118 = vmatprep.subr.bf16.mxu0 %v1142_v0 }
  0x56   :  { %1048 = vmatpush3.bf16.msra.mxu1 %v1047_v8  ;;  %1120 = vmatpush3.bf16.msra.mxu0 %v1243_v32 }
  0x57   :  { %1049 = vmatprep.subr.bf16.mxu1 %v1142_v0  ;;  %1121 = vmatprep.subr.bf16.mxu0 %v1142_v0 }
  0x5a   :  { %1051 = vmatpush3.bf16.msra.mxu1 %v1050_v13  ;;  %1123 = vmatpush3.bf16.msra.mxu0 %v1273_v41 }
  0x5b   :  { %1052 = vmatprep.subr.bf16.mxu1 %v1142_v0  ;;  %1124 = vmatprep.subr.bf16.mxu0 %v1142_v0 }
  0x5e   :  { %1054 = vmatpush3.bf16.msra.mxu1 %v1053_v18  ;;  %1126 = vmatpush3.bf16.msra.mxu0 %v1304_v53 }
  0x5f   :  { %1055 = vmatprep.subr.bf16.mxu1 %v1142_v0  ;;  %1127 = vmatprep.subr.bf16.mxu0 %v1142_v0 }
  0x62   :  { %1057 = vmatpush3.bf16.msra.mxu1 %v1056_v23  ;;  %1129 = vmatpush3.bf16.msra.mxu0 %v1325_v63 }
  0x65   :  { %879 = vmatmul.mubr.f32.vlgmr.msra.gmra.mrb[0].mxu1 %v1265_v40  ;;  %984 = vmatmul.mubr.f32.vlgmr.msra.gmra.mrb[0].mxu0 %v1237_v30 }
 0x138   :  { %v370_v31 = vpop.f32.mrb[0].mxu1  ;;  %v665_v32 = vpop.f32.mrb[0].mxu0 }
 0x139   :  { %v1130_v37 = vadd.f32 %v665_v32, %v370_v31  ;;  %v880_v38 = vpop.f32.mrb[1].mxu1  ;;  %v985_v41 = vpop.f32.mrb[1].mxu0 }
 0x13b   :  { %669 = vst [vmem:[%s1463_s2] sm:$0xff] %v1130_v37 }

</bundles_post_ra>
